<compile_context>
chip_gen: v5e
topology: v5e:2x2
jax: 0.10.0
libtpu: 0.0.40
codegen_flags: <defaults>
</compile_context>

<pallas_src>
import functools

import jax
import jax.numpy as jnp
import numpy as np
from jax.experimental import pallas as pl
from jax.experimental.pallas import tpu as pltpu


def _sublayer_connection_kernel(x_ref, a2_ref, b2_ref, w_ref, bias_ref, *rest,
                                eps, dropout_rate):
    if dropout_rate > 0.0:
        bits_ref, o_ref = rest
    else:
        bits_ref = None
        (o_ref,) = rest

    x = x_ref[...].astype(jnp.float32)                 # (TM, D): rows x lanes
    d = x.shape[-1]

    # --- LayerNorm (module semantics: unbiased std, eps added to the std) ---
    mean = jnp.mean(x, axis=-1, keepdims=True)
    xc = x - mean
    var = jnp.sum(xc * xc, axis=-1, keepdims=True) * (1.0 / (d - 1))
    # NOTE: pl.reciprocal(..., approx=True) would push this onto the EUP, but it
    # has no CPU-interpret lowering; a plain divide keeps the kernel portable.
    inv_std = 1.0 / (jnp.sqrt(var) + eps)
    y = a2_ref[...] * (xc * inv_std) + b2_ref[...]

    # --- sublayer: Linear(D, D) on the MXU (bf16 operands, f32 accumulate) ---
    z = jnp.dot(y.astype(w_ref.dtype), w_ref[...],
                preferred_element_type=jnp.float32)
    z = z + bias_ref[...].astype(jnp.float32)

    # --- dropout: integer-threshold compare on precomputed uniform bits ---
    if dropout_rate > 0.0:
        keep = 1.0 - dropout_rate
        thr = np.uint32(min(int(round(keep * 2.0 ** 32)), 2 ** 32 - 1))
        mask = bits_ref[...] < thr                     # keep with prob `keep`
        z = jnp.where(mask, z * (1.0 / keep), 0.0)

    # --- residual connection ---
    o_ref[...] = (x + z).astype(o_ref.dtype)


def sublayer_connection(x, a2, b2, w, bias, *, dropout_rate=0.1, rng_key=None,
                        eps=1e-6, tile_rows=256, matmul_dtype=jnp.bfloat16):
    """x: [B, S, D]; a2, b2, bias: [D]; w: [D, D]."""
    B, S, D = x.shape
    R = B * S
    tm = min(tile_rows, R)
    assert R % tm == 0, "row count must be divisible by the row tile"
    assert tm == R or tm % 8 == 0, "row tile must be a multiple of 8 sublanes"

    xf = x.reshape(R, D)
    w_c = w.astype(matmul_dtype)                       # halve W VMEM/HBM footprint

    inputs = [xf, a2.reshape(1, D), b2.reshape(1, D), w_c, bias.reshape(1, D)]
    in_specs = [
        pl.BlockSpec((tm, D), lambda i: (i, 0)),       # x row tile (pipelined)
        pl.BlockSpec((1, D), lambda i: (0, 0)),        # a_2  (resident)
        pl.BlockSpec((1, D), lambda i: (0, 0)),        # b_2  (resident)
        pl.BlockSpec((D, D), lambda i: (0, 0)),        # W    (resident)
        pl.BlockSpec((1, D), lambda i: (0, 0)),        # bias (resident)
    ]
    if dropout_rate > 0.0:
        if rng_key is None:
            raise ValueError("rng_key is required when dropout_rate > 0")
        bits = jax.random.bits(rng_key, (R, D), dtype=jnp.uint32)
        inputs.append(bits)
        in_specs.append(pl.BlockSpec((tm, D), lambda i: (i, 0)))

    # VMEM budget: double-buffered row tiles (x, out, [bits]) + resident params.
    io_itemsize = jnp.dtype(x.dtype).itemsize
    tile_io_bytes = tm * D * (2 * io_itemsize + (4 if dropout_rate > 0.0 else 0))
    w_bytes = D * D * jnp.dtype(matmul_dtype).itemsize
    param_bytes = 3 * D * 4
    vmem_needed = 2 * tile_io_bytes + 2 * (w_bytes + param_bytes)
    vmem_limit = min(int(vmem_needed * 1.25) + (4 << 20), 100 << 20)
    # TODO(synk): on v7x (64 MiB VMEM) with very large D, add a second grid axis
    # over output columns (W block (D, TN)) instead of keeping all of W resident.

    kernel = functools.partial(_sublayer_connection_kernel,
                               eps=eps, dropout_rate=dropout_rate)

    out = pl.pallas_call(
        kernel,
        out_shape=jax.ShapeDtypeStruct((R, D), x.dtype),
        grid=(R // tm,),
        in_specs=in_specs,
        out_specs=pl.BlockSpec((tm, D), lambda i: (i, 0)),
        compiler_params=pltpu.CompilerParams(
            dimension_semantics=("parallel",),          # independent row tiles
            vmem_limit_bytes=vmem_limit),
    )(*inputs)

    return out.reshape(B, S, D)


def _reference_no_dropout(x, a2, b2, w, bias, *, eps=1e-6,
                          matmul_dtype=jnp.bfloat16):
    """Pure-JAX reference matching the module semantics, dropout disabled."""
    xf = x.astype(jnp.float32)
    mean = jnp.mean(xf, axis=-1, keepdims=True)
    xc = xf - mean
    std = jnp.sqrt(jnp.sum(xc * xc, axis=-1, keepdims=True) / (x.shape[-1] - 1))
    y = a2 * xc / (std + eps) + b2
    z = jnp.dot(y.astype(matmul_dtype), w.astype(matmul_dtype),
                preferred_element_type=jnp.float32) + bias
    return (xf + z).astype(x.dtype)


if __name__ == "__main__":
    B, S, D = 2, 8, 32          # batch=2, seq=8, hidden(size)=32
    dropout_p = 0.1

    key = jax.random.PRNGKey(0)
    kx, kw, kb, kd = jax.random.split(key, 4)

    x = jax.random.normal(kx, (B, S, D), dtype=jnp.float32)

    # LayerNorm params (as in __init__: ones / zeros)
    a2 = jnp.ones((D,), jnp.float32)
    b2 = jnp.zeros((D,), jnp.float32)
    # Deterministic sublayer (Linear D->D) params
    w = jax.random.normal(kw, (D, D), dtype=jnp.float32) * 0.05
    bias = jax.random.normal(kb, (D,), dtype=jnp.float32) * 0.01

    # 1) Correctness check against pure-JAX reference with dropout disabled.
    out_nodrop = sublayer_connection(x, a2, b2, w, bias, dropout_rate=0.0)
    ref = _reference_no_dropout(x, a2, b2, w, bias)
    jax.block_until_ready(out_nodrop)
    max_err = float(jnp.max(jnp.abs(out_nodrop - ref)))
    assert jnp.allclose(out_nodrop, ref, atol=5e-3, rtol=5e-3), max_err

    # 2) Full forward with fused stochastic dropout (training mode).
    out = sublayer_connection(x, a2, b2, w, bias, dropout_rate=dropout_p,
                              rng_key=kd)
    jax.block_until_ready(out)
    assert out.shape == (B, S, D)
    assert bool(jnp.all(jnp.isfinite(out)))

    print("KERNEL_OK")
</pallas_src>

<mosaic_0001>
module attributes {stable_mosaic.version = 11 : i64} {
  func.func @_sublayer_connection_kernel(%arg0: i32, %arg1: memref<16x32xf32, #tpu.memory_space<vmem>>, %arg2: memref<1x32xf32, #tpu.memory_space<vmem>>, %arg3: memref<1x32xf32, #tpu.memory_space<vmem>>, %arg4: memref<32x32xbf16, #tpu.memory_space<vmem>>, %arg5: memref<1x32xf32, #tpu.memory_space<vmem>>, %arg6: memref<16x32xf32, #tpu.memory_space<vmem>>) attributes {dimension_semantics = [#tpu.dimension_semantics<parallel>], iteration_bounds = array<i64: 1>, scalar_prefetch = 0 : i64, scratch_operands = 0 : i64, tpu.core_type = #tpu.core_type<tc>, window_params = [{transform_indices = @transform_0, window_bounds = array<i64: 16, 32>}, {pipeline_mode = #tpu.pipeline_mode<synchronous>, transform_indices = @transform_1, window_bounds = array<i64: 1, 32>}, {pipeline_mode = #tpu.pipeline_mode<synchronous>, transform_indices = @transform_2, window_bounds = array<i64: 1, 32>}, {pipeline_mode = #tpu.pipeline_mode<synchronous>, transform_indices = @transform_3, window_bounds = array<i64: 32, 32>}, {pipeline_mode = #tpu.pipeline_mode<synchronous>, transform_indices = @transform_4, window_bounds = array<i64: 1, 32>}, {transform_indices = @transform_5, window_bounds = array<i64: 16, 32>}]} {
    %c0 = arith.constant 0 : index
    %c0_0 = arith.constant 0 : index
    %0 = vector.load %arg1[%c0, %c0_0] : memref<16x32xf32, #tpu.memory_space<vmem>>, vector<16x32xf32>
    %cst = arith.constant dense<0.000000e+00> : vector<16xf32>
    %1 = vector.multi_reduction <add>, %0, %cst [1] : vector<16x32xf32> to vector<16xf32>
    %2 = vector.shape_cast %1 : vector<16xf32> to vector<16x1xf32>
    %cst_1 = arith.constant 3.200000e+01 : f32
    %3 = vector.broadcast %cst_1 : f32 to vector<16x1xf32>
    %4 = arith.divf %2, %3 : vector<16x1xf32>
    %5 = vector.broadcast %4 : vector<16x1xf32> to vector<16x32xf32>
    %6 = arith.subf %0, %5 : vector<16x32xf32>
    %7 = arith.mulf %6, %6 : vector<16x32xf32>
    %cst_2 = arith.constant dense<0.000000e+00> : vector<16xf32>
    %8 = vector.multi_reduction <add>, %7, %cst_2 [1] : vector<16x32xf32> to vector<16xf32>
    %9 = vector.shape_cast %8 : vector<16xf32> to vector<16x1xf32>
    %cst_3 = arith.constant 0.0322580636 : f32
    %10 = vector.broadcast %cst_3 : f32 to vector<16x1xf32>
    %11 = arith.mulf %9, %10 : vector<16x1xf32>
    %12 = math.sqrt %11 : vector<16x1xf32>
    %cst_4 = arith.constant 9.99999997E-7 : f32
    %13 = vector.broadcast %cst_4 : f32 to vector<16x1xf32>
    %14 = arith.addf %12, %13 : vector<16x1xf32>
    %cst_5 = arith.constant 1.000000e+00 : f32
    %15 = vector.broadcast %cst_5 : f32 to vector<16x1xf32>
    %16 = arith.divf %15, %14 : vector<16x1xf32>
    %c0_6 = arith.constant 0 : index
    %c0_7 = arith.constant 0 : index
    %17 = vector.load %arg2[%c0_6, %c0_7] : memref<1x32xf32, #tpu.memory_space<vmem>>, vector<1x32xf32>
    %18 = vector.broadcast %16 : vector<16x1xf32> to vector<16x32xf32>
    %19 = arith.mulf %6, %18 : vector<16x32xf32>
    %20 = vector.broadcast %17 : vector<1x32xf32> to vector<16x32xf32>
    %21 = arith.mulf %20, %19 : vector<16x32xf32>
    %c0_8 = arith.constant 0 : index
    %c0_9 = arith.constant 0 : index
    %22 = vector.load %arg3[%c0_8, %c0_9] : memref<1x32xf32, #tpu.memory_space<vmem>>, vector<1x32xf32>
    %23 = vector.broadcast %22 : vector<1x32xf32> to vector<16x32xf32>
    %24 = arith.addf %21, %23 : vector<16x32xf32>
    %25 = arith.truncf %24 : vector<16x32xf32> to vector<16x32xbf16>
    %c0_10 = arith.constant 0 : index
    %c0_11 = arith.constant 0 : index
    %26 = vector.load %arg4[%c0_10, %c0_11] : memref<32x32xbf16, #tpu.memory_space<vmem>>, vector<32x32xbf16>
    %cst_12 = arith.constant dense<0.000000e+00> : vector<16x32xf32>
    %27 = tpu.matmul %25, %26, %cst_12 {dimension_numbers = #tpu.dot_dimension_numbers<[1], [0], [0], [1], [0, 0, 1, 1], [], []>} : vector<16x32xbf16>, vector<32x32xbf16>, vector<16x32xf32> -> vector<16x32xf32>
    %c0_13 = arith.constant 0 : index
    %c0_14 = arith.constant 0 : index
    %28 = vector.load %arg5[%c0_13, %c0_14] : memref<1x32xf32, #tpu.memory_space<vmem>>, vector<1x32xf32>
    %29 = vector.broadcast %28 : vector<1x32xf32> to vector<16x32xf32>
    %30 = arith.addf %27, %29 : vector<16x32xf32>
    %31 = arith.addf %0, %30 : vector<16x32xf32>
    %c0_15 = arith.constant 0 : index
    %c0_16 = arith.constant 0 : index
    %32 = vector.load %arg6[%c0_15, %c0_16] : memref<16x32xf32, #tpu.memory_space<vmem>>, vector<16x32xf32>
    tpu.vector_store %arg6[%c0_15, %c0_16], %31 {strides = array<i32>} : memref<16x32xf32, #tpu.memory_space<vmem>>, vector<16x32xf32>,
    return
  }
  func.func @transform_0(%arg0: i32) -> (i32, i32) {
    %c0_i32 = arith.constant 0 : i32
    %c0_i32_0 = arith.constant 0 : i32
    return %arg0, %c0_i32 : i32, i32
  }
  func.func @transform_1(%arg0: i32) -> (i32, i32) {
    %c0_i32 = arith.constant 0 : i32
    %c0_i32_0 = arith.constant 0 : i32
    %c0_i32_1 = arith.constant 0 : i32
    return %c0_i32, %c0_i32_0 : i32, i32
  }
  func.func @transform_2(%arg0: i32) -> (i32, i32) {
    %c0_i32 = arith.constant 0 : i32
    %c0_i32_0 = arith.constant 0 : i32
    %c0_i32_1 = arith.constant 0 : i32
    return %c0_i32, %c0_i32_0 : i32, i32
  }
  func.func @transform_3(%arg0: i32) -> (i32, i32) {
    %c0_i32 = arith.constant 0 : i32
    %c0_i32_0 = arith.constant 0 : i32
    %c0_i32_1 = arith.constant 0 : i32
    return %c0_i32, %c0_i32_0 : i32, i32
  }
  func.func @transform_4(%arg0: i32) -> (i32, i32) {
    %c0_i32 = arith.constant 0 : i32
    %c0_i32_0 = arith.constant 0 : i32
    %c0_i32_1 = arith.constant 0 : i32
    return %c0_i32, %c0_i32_0 : i32, i32
  }
  func.func @transform_5(%arg0: i32) -> (i32, i32) {
    %c0_i32 = arith.constant 0 : i32
    %c0_i32_0 = arith.constant 0 : i32
    return %arg0, %c0_i32 : i32, i32
  }
}

</mosaic_0001>

<bundles_post_ra>
// kernel: tpu_custom_call.1
= control target key start
LH: loop header
LB: loop body
LE: loop exit
PB: predicated region body
PF: predicated region fallthrough
CT: control target
= control target key end

     0   :  { %10 = vsyncpa [#allocation3], 0  ;;  %s454_s0 = inlined_call_operand.hbm [shape: f32[16,32], index: 0, kind: input, shape index: {}]   ;;  %s455_s1 = inlined_call_operand.hbm [shape: f32[1,32], index: 1, kind: input, shape index: {}]   ;;  %s456_s2 = inlined_call_operand.vmem [shape: f32[1,32], index: 2, kind: input, shape index: {}]   ;;  %s457_s3 = inlined_call_operand.hbm [shape: bf16[32,32], index: 3, kind: input, shape index: {}]   ;;  %s458_s4 = inlined_call_operand.vmem [shape: f32[1,32], index: 4, kind: input, shape index: {}]   ;;  %s459_s5 = inlined_call_operand.hbm [shape: f32[16,32], index: 5, kind: output, shape index: {}]  }
   0x1   :  { %11 = vsyncpa [#allocation6], 0  ;;  %s31_s20 = sshll.u32 %s455_s1, 4  ;;  %s32_s20 = int_to_ptr.hbm [resolvable:$true] %s31_s20 }
   0x2   :  { %12 = vsyncpa [#allocation4], 0  ;;  %s364_s21 = smov [#allocation5]   ;;  %s17_s25 = sshll.u32 %s454_s0, 4  ;;  %s18_s25 = int_to_ptr.hbm [resolvable:$true] %s17_s25 }
   0x3   :  { %s33_s22 = sshll.u32 %s364_s21, 4  ;;  %s365_s26 = smov [#allocation2]   ;;  %s34_s22 = int_to_ptr.vmem [resolvable:$true] %s33_s22 }
   0x4   :  { %36 = dma.hbm_to_vmem [thread:$0]  %s32_s20, 16, %s34_s22, [#allocation6]  }
   0x5   :  { %s19_s27 = sshll.u32 %s365_s26, 4  ;;  %s366_s28 = smov 128   ;;  %s20_s27 = int_to_ptr.vmem [resolvable:$true] %s19_s27 }
   0x6   :  { %s367_s29 = smov 8   ;;  %s43_s6 = sshll.u32 %s457_s3, 4  ;;  %s44_s6 = int_to_ptr.hbm [resolvable:$true] %s43_s6 }
   0x7   :  { %25 = dma.hbm_to_vmem [thread:$0]  %s18_s25, 256, %s20_s27, [#allocation3], %s366_s28, %s366_s28, %s367_s29  }
   0x8   :  { %s368_s7 = smov [#allocation7]   ;;  %s369_s0 = smov 64  }
   0x9   :  { %s45_s8 = sshll.u32 %s368_s7, 4  ;;  %s370_s9 = smov 4   ;;  %s46_s8 = int_to_ptr.vmem [resolvable:$true] %s45_s8 }
   0xa   :  { %51 = dma.hbm_to_vmem [thread:$0]  %s44_s6, 256, %s46_s8, [#allocation6], %s369_s0, %s369_s0, %s370_s9  }
   0xb   :  { %358 = dma.done.wait [#allocation3], 256  }
   0xc   :  { %359 = vsyncadd [#allocation3], 4294967040 }
   0xd   :  { %360 = dma.done.wait [#allocation6], 272  }
   0xe   :  { %361 = vsyncadd [#allocation6], 4294967024  ;;  %vm69_vm0 = vcmask 261120   ;;  %v415_v0 = vld [vmem:[#allocation2] sm:$0xff]  ;;  %v419_v2 = vld [vmem:[#allocation2 + $0x8] sm:$0xff]  ;;  %v371_v4 = vmov 32.0  }
   0xf   :  { %v70_v1 = vsel %vm69_vm0, %v415_v0, 0.0  ;;  %v73_v3 = vsel %vm69_vm0, %v419_v2, 0.0  ;;  %252 = vrcp.f32 %v371_v4  ;;  %v239_v21 = vld [vmem:[#allocation7 + $0x8] sm:$0xff]  ;;  %v238_v23 = vld [vmem:[#allocation7] sm:$0xff]  ;;  %s372_s13 = smov [#allocation8]   ;;  %s215_s16 = sshll.u32 %s459_s5, 4  ;;  %s216_s16 = int_to_ptr.hbm [resolvable:$true] %s215_s16 }
  0x10   :  { %71 = vadd.xlane.f32.xlu0 %v70_v1  ;;  %197 = vmatpush.bf16.msra.mxu0 %v239_v21  ;;  %s213_s14 = sshll.u32 %s372_s13, 4  ;;  %s214_s14 = int_to_ptr.vmem [resolvable:$true] %s213_s14 }
  0x14   :  { %198 = vmatpush.bf16.msra.mxu0 %v238_v23 }
  0x15   :  { %v253_v5 = vpop.eup %252 }
  0x16   :  { %v77_v6 = vmul.f32 32.0, %v253_v5  ;;  %vm81_vm1 = vweird.f32 %v253_v5 }
  0x18   :  { %74 = vadd.xlane.f32.xlu0 %v73_v3  ;;  %v78_v7 = vsub.f32 1.0, %v77_v6 }
  0x1a   :  { %v79_v8 = vmul.f32 %v253_v5, %v78_v7 }
  0x1c   :  { %v80_v9 = vadd.f32 %v253_v5, %v79_v8 }
  0x1e   :  { %v82_v10 = vsel %vm81_vm1, %v253_v5, %v80_v9  ;;  %v249_v5 = vld [vmem:[#allocation5] ss:$0 sm:$0xff] }
  0x83   :  { %v72_v11 = vpop.xlane.xlu0 %71 }
  0x84   :  { %v83_v12 = vmul.f32 %v82_v10, %v72_v11  ;;  %v250_v11 = vld [vmem:[%s456_s2] ss:$0 sm:$0xff] }
  0x86   :  { %v424_v13 = vsub.f32 %v415_v0, %v83_v12 }
  0x88   :  { %v87_v14 = vmul.f32 %v424_v13, %v424_v13 }
  0x8a   :  { %v89_v15 = vsel %vm69_vm0, %v87_v14, 0.0 }
  0x8b   :  { %90 = vadd.xlane.f32.xlu1 %v89_v15  ;;  %v75_v16 = vpop.xlane.xlu0 %74 }
  0x8c   :  { %v84_v17 = vmul.f32 %v82_v10, %v75_v16 }
  0x8e   :  { %v430_v18 = vsub.f32 %v419_v2, %v84_v17 }
  0x90   :  { %v88_v19 = vmul.f32 %v430_v18, %v430_v18 }
  0x92   :  { %v92_v20 = vsel %vm69_vm0, %v88_v19, 0.0 }
  0x93   :  { %93 = vadd.xlane.f32.xlu1 %v92_v20 }
  0xfe   :  { %v91_v22 = vpop.xlane.xlu1 %90 }
  0xff   :  { %v95_v24 = vmul.f32 0.032258064, %v91_v22 }
 0x101   :  { %254 = vrsqrt.f32 %v95_v24  ;;  %vm104_vm2 = vcmp.eq.f32.partialorder %v95_v24, inf  ;;  %v107_v37 = vand.u32 2147483648, %v95_v24  ;;  %vm106_vm3 = vcmp.eq.f32.partialorder %v95_v24, 0.0 }
 0x106   :  { %v94_v25 = vpop.xlane.xlu1 %93 }
 0x107   :  { %v255_v26 = vpop.eup %254  ;;  %v96_v27 = vmul.f32 0.032258064, %v94_v25 }
 0x108   :  { %v98_v28 = vmul.f32 %v255_v26, %v95_v24 }
 0x109   :  { %256 = vrsqrt.f32 %v96_v27  ;;  %vm116_vm4 = vcmp.eq.f32.partialorder %v96_v27, inf  ;;  %v119_v45 = vand.u32 2147483648, %v96_v27  ;;  %vm118_vm5 = vcmp.eq.f32.partialorder %v96_v27, 0.0 }
 0x10a   :  { %v99_v29 = vmul.f32 %v255_v26, %v98_v28 }
 0x10c   :  { %v100_v30 = vmul.f32 0.5, %v99_v29 }
 0x10e   :  { %v101_v31 = vsub.f32 1.5, %v100_v30 }
 0x10f   :  { %v257_v32 = vpop.eup %256 }
 0x110   :  { %v102_v33 = vmul.f32 %v255_v26, %v101_v31  ;;  %v110_v34 = vmul.f32 %v257_v32, %v96_v27 }
 0x112   :  { %v103_v35 = vmul.f32 %v102_v33, %v95_v24  ;;  %v111_v36 = vmul.f32 %v257_v32, %v110_v34 }
 0x114   :  { %v105_v38 = vsel %vm104_vm2, %v95_v24, %v103_v35  ;;  %v112_v39 = vmul.f32 0.5, %v111_v36 }
 0x115   :  { %v108_v40 = vsel %vm106_vm3, %v107_v37, %v105_v38 }
 0x116   :  { %v113_v41 = vsub.f32 1.5, %v112_v39  ;;  %v121_v42 = vadd.f32 1e-06, %v108_v40 }
 0x118   :  { %v114_v43 = vmul.f32 %v257_v32, %v113_v41  ;;  %258 = vrcp.f32 %v121_v42  ;;  %v134_v53 = vand.u32 2147483648, %v121_v42  ;;  %vm128_vm7 = vweird.f32 %v121_v42 }
 0x119   :  { %v132_v55 = vand.u32 2147483647, %v121_v42 }
 0x11a   :  { %v115_v44 = vmul.f32 %v114_v43, %v96_v27  ;;  %v135_v59 = vor.u32 1.1754944e-38, %v134_v53 }
 0x11b   :  { %vm133_vm9 = vcmp.eq.f32.partialorder %v132_v55, 8.507059e+37 }
 0x11c   :  { %v117_v46 = vsel %vm116_vm4, %v96_v27, %v115_v44 }
 0x11d   :  { %v120_v47 = vsel %vm118_vm5, %v119_v45, %v117_v46 }
 0x11e   :  { %v259_v48 = vpop.eup %258  ;;  %v122_v49 = vadd.f32 1e-06, %v120_v47 }
 0x11f   :  { %v124_v50 = vmul.f32 %v259_v48, %v121_v42  ;;  %vm129_vm6 = vweird.f32 %v259_v48 }
 0x120   :  { %260 = vrcp.f32 %v122_v49  ;;  %vm130_vm8 = vmor %vm128_vm7, %vm129_vm6  ;;  %v149_v62 = vand.u32 2147483648, %v122_v49  ;;  %v147_v1 = vand.u32 2147483647, %v122_v49  ;;  %vm143_vm11 = vweird.f32 %v122_v49 }
 0x121   :  { %v125_v51 = vsub.f32 1.0, %v124_v50 }
 0x122   :  { %v150_v6 = vor.u32 1.1754944e-38, %v149_v62  ;;  %vm148_vm13 = vcmp.eq.f32.partialorder %v147_v1, 8.507059e+37 }
 0x123   :  { %v126_v52 = vmul.f32 %v259_v48, %v125_v51 }
 0x125   :  { %v127_v54 = vadd.f32 %v259_v48, %v126_v52 }
 0x126   :  { %v261_v56 = vpop.eup %260 }
 0x127   :  { %v131_v57 = vsel %vm130_vm8, %v259_v48, %v127_v54  ;;  %v139_v58 = vmul.f32 %v261_v56, %v122_v49  ;;  %vm144_vm10 = vweird.f32 %v261_v56 }
 0x128   :  { %v136_v61 = vsel %vm133_vm9, %v135_v59, %v131_v57  ;;  %vm145_vm12 = vmor %vm143_vm11, %vm144_vm10 }
 0x129   :  { %v140_v60 = vsub.f32 1.0, %v139_v58  ;;  %v154_v4 = vmul.f32 %v136_v61, %v424_v13  ;;  %v251_v13 = vld [vmem:[%s458_s4] ss:$0 sm:$0xff] }
 0x12b   :  { %v141_v63 = vmul.f32 %v261_v56, %v140_v60  ;;  %v159_v10 = vmul.f32 %v249_v5, %v154_v4 }
 0x12d   :  { %v142_v3 = vadd.f32 %v261_v56, %v141_v63  ;;  %v165_v14 = vadd.f32 %v250_v11, %v159_v10 }
 0x12f   :  { %v146_v7 = vsel %vm145_vm12, %v261_v56, %v142_v3 }
 0x130   :  { %v151_v8 = vsel %vm148_vm13, %v150_v6, %v146_v7 }
 0x131   :  { %v155_v9 = vmul.f32 %v151_v8, %v430_v18 }
 0x133   :  { %v160_v12 = vmul.f32 %v249_v5, %v155_v9 }
 0x135   :  { %v166_v15 = vadd.f32 %v250_v11, %v160_v12 }
 0x137   :  { %v167_v16 = vpack.c.bf16 %v166_v15, %v165_v14 }
 0x139   :  { %237 = vmatmul.msk.bf16.vlgmr.msra.gmra.mxu0 %vm69_vm0, %v167_v16 }
 0x1b6   :  { %v200_v17 = vpop.f32.mrf.mxu0 }
 0x1b7   :  { %v201_v19 = vadd.f32 %v251_v13, %v200_v17 }
 0x1b9   :  { %v205_v20 = vadd.f32 %v201_v19, %v415_v0 }
 0x1bb   :  { %207 = vst.msk [vmem:[#allocation8] sm:$0xff] %vm69_vm0, %v205_v20 }
 0x1be   :  { %v202_v18 = vpop.f32.mrf.mxu0 }
 0x1bf   :  { %v203_v21 = vadd.f32 %v251_v13, %v202_v18 }
 0x1c1   :  { %v206_v22 = vadd.f32 %v203_v21, %v419_v2 }
 0x1c3   :  { %208 = vst.msk [vmem:[#allocation8 + $0x8] sm:$0xff] %vm69_vm0, %v206_v22 }
 0x1c4   :  { %221 = dma.vmem_to_hbm [thread:$0]  %s214_s14, 256, %s216_s16, [#allocation4], %s366_s28, %s366_s28, %s367_s29  }
 0x1c5   :  { %362 = dma.done.wait [#allocation4], 256  }
 0x1c6   :  { %363 = vsyncadd [#allocation4], 4294967040 }
 0x1c7   :  { %226 = vsyncpa [#allocation3], 1 }
 0x1c8   :  { %227 = vsyncpa [#allocation6], 1 }
 0x1c9   :  { %228 = vsyncpa [#allocation4], 1 }

</bundles_post_ra>
